<compile_context>
chip_gen: v5e
topology: v5e:2x2
jax: 0.10.0
libtpu: 0.0.40
codegen_flags: <defaults>
</compile_context>

<pallas_src>
import jax
import jax.numpy as jnp
from jax.experimental import pallas as pl
from jax.experimental.pallas import tpu as pltpu


def _round_up(a, b):
    return (a + b - 1) // b * b


# ----------------------------------------------------------------------------
# Kernel 1: layer-1 graph conv,  h1^T = relu(g1^T @ A^T)
#   grid = (J, K): J = output node tiles, K = reduction (neighbour) tiles.
#   bf16 x bf16 MXU dots, f32 accumulation, lane-dense [32, TJ] outputs.
# ----------------------------------------------------------------------------
def _ginet_layer1_kernel(g1t_ref, adjt_ref, h1t_ref, acc_ref):
    k = pl.program_id(1)

    @pl.when(k == 0)
    def _():
        acc_ref[...] = jnp.zeros_like(acc_ref)

    acc_ref[...] += jnp.dot(g1t_ref[...], adjt_ref[...],
                            preferred_element_type=jnp.float32)

    @pl.when(k == pl.num_programs(1) - 1)
    def _():
        h1t_ref[...] = jnp.maximum(acc_ref[...], 0.0).astype(h1t_ref.dtype)


# ----------------------------------------------------------------------------
# Kernel 2: layer-2 graph conv + scatter_mean pooling + fc1/relu/fc2.
#   h2^T = relu((W2^T @ h1^T_tile) @ A^T_tile)        (accumulated over K)
#   pooled^T += h2^T_tile @ pool^T_tile               (accumulated over J)
#   out^T = fc2^T @ relu(fc1^T @ pooled^T + b1^T) + b2^T   (last grid step)
# ----------------------------------------------------------------------------
def _ginet_layer2_tail_kernel(h1t_ref, adjt_ref, w2t_ref, poolt_ref,
                              fc1wt_ref, fc1bt_ref, fc2wt_ref, fc2bt_ref,
                              outt_ref, acc_ref, pool_acc_ref):
    j = pl.program_id(0)
    k = pl.program_id(1)
    nj = pl.num_programs(0)
    nk = pl.num_programs(1)

    @pl.when((j == 0) & (k == 0))
    def _():
        pool_acc_ref[...] = jnp.zeros_like(pool_acc_ref)

    @pl.when(k == 0)
    def _():
        acc_ref[...] = jnp.zeros_like(acc_ref)

    # Branch-fused layer-2 weights applied on the fly to the streamed h1 tile
    # (64x32xTK MACs, ~32/TJ of the main dot -> negligible), then the big
    # lane-dense bf16 adjacency dot with f32 accumulation.
    g2 = jnp.dot(w2t_ref[...], h1t_ref[...],
                 preferred_element_type=jnp.float32)
    acc_ref[...] += jnp.dot(g2.astype(jnp.bfloat16), adjt_ref[...],
                            preferred_element_type=jnp.float32)

    @pl.when(k == nk - 1)
    def _():
        h2 = jnp.maximum(acc_ref[...], 0.0)                     # [64, TJ] f32
        # scatter_mean: pool^T already carries 1/count (f32 -> exact mean).
        pool_acc_ref[...] += jnp.dot(h2, poolt_ref[...],
                                     preferred_element_type=jnp.float32)

    @pl.when((j == nj - 1) & (k == nk - 1))
    def _():
        y = jnp.dot(fc1wt_ref[...], pool_acc_ref[...],
                    preferred_element_type=jnp.float32) + fc1bt_ref[...]
        y = jnp.maximum(y, 0.0)
        # TODO(synk): Dropout(p=0.4) is stochastic in training; eval identity.
        outt_ref[...] = (jnp.dot(fc2wt_ref[...], y,
                                 preferred_element_type=jnp.float32)
                         + fc2bt_ref[...])


# ----------------------------------------------------------------------------
# Wrapper
# ----------------------------------------------------------------------------
def ginet_forward(params, x, edge_index, edge_attr, batch, num_graphs,
                  tile=512):
    """Matches GINet.forward in eval mode.

    `edge_attr` is accepted for API parity but has no effect on the output:
    softmax over the size-1 attention axis is identically 1.0, so the
    edge/attention sub-network is a provable no-op (the pure-JAX reference
    below keeps the full path and confirms this).
    """
    del edge_attr  # mathematically irrelevant to the output (see docstring)
    n, fin = x.shape
    row, col = edge_index[0], edge_index[1]
    out_dim = params['fc2_w'].shape[1]

    # ---- tile plan (node axis zero-padded: exact no-op for all outputs) ----
    # TODO(synk): bump tile to 1024 on v6e (128 MiB VMEM); 512 fits every
    # generation (incl. v7x's 64 MiB) well under the 32 MiB scoped limit.
    # TODO(synk): if traces show exposed DMA on v5e, add
    # pipeline_mode=pl.Buffered(3) to the A^T BlockSpecs.
    if n <= tile:
        n_pad = _round_up(max(n, 1), 128)
        tj = tk = n_pad
    else:
        n_pad = _round_up(n, tile)
        tj = tk = tile
    gj, gk = n_pad // tj, n_pad // tk

    # ---- structural operands, built directly in their kernel dtype ---------
    # A^T[c, r] = #edges(r, c); small integer counts are exact in bf16.
    # TODO(synk): exact only while per-pair edge multiplicity <= 256; ship
    # f32/int adjacency if multigraphs can exceed that.  For realistically
    # sparse graphs (E ~ O(N)) a CSR/segment kernel (scalar-prefetched
    # neighbour lists) should replace the dense adjacency altogether.
    adj_t = jnp.zeros((n_pad, n_pad), jnp.bfloat16).at[col, row].add(
        jnp.ones(row.shape, jnp.bfloat16))

    # scatter_mean as one matrix: pool^T[i, g] = (batch[i]==g) / count(g),
    # kept f32 so the mean's division stays exact; zero-node graphs guarded.
    onehot = jax.nn.one_hot(batch, num_graphs, dtype=jnp.float32)        # [N, G]
    cnt = onehot.sum(axis=0)
    inv = jnp.where(cnt > 0, 1.0 / cnt, 0.0)
    pool_t = jnp.zeros((n_pad, num_graphs), jnp.float32).at[:n].set(
        onehot * inv[None, :])

    # ---- branch-fused weights (data / data_ext share every pass over A) ----
    w1 = jnp.concatenate([params['conv1']['w_fc'],
                          params['conv1_ext']['w_fc']], axis=1)          # [Fin, 32]
    w2a, w2b = params['conv2']['w_fc'], params['conv2_ext']['w_fc']      # [16, 32]
    w2 = jnp.concatenate(
        [jnp.concatenate([w2a, jnp.zeros_like(w2b)], axis=1),
         jnp.concatenate([jnp.zeros_like(w2a), w2b], axis=1)], axis=0)   # [32, 64]
    w2t = w2.T.astype(jnp.bfloat16)                                      # [64, 32]

    # Tiny [N,Fin]@[Fin,32] done once here in f32 (overlaps with the adjacency
    # build), then transposed so the node axis is lane-dense in the kernels.
    x_pad = jnp.zeros((n_pad, fin), jnp.float32).at[:n].set(x)
    g1t = (x_pad @ w1).T.astype(jnp.bfloat16)                            # [32, Np]

    fc1wt = params['fc1_w'].T                                            # [128, 64]
    fc1bt = params['fc1_b'].T                                            # [128, 1]
    fc2wt = params['fc2_w'].T                                            # [out, 128]
    fc2bt = params['fc2_b'].T                                            # [out, 1]

    vmem_limit = 32 * 1024 * 1024

    # ---- layer 1: A^T streamed in bf16 tiles, node-tile axis megacore-able --
    h1t = pl.pallas_call(
        _ginet_layer1_kernel,
        out_shape=jax.ShapeDtypeStruct((32, n_pad), jnp.bfloat16),
        grid=(gj, gk),
        in_specs=[pl.BlockSpec((32, tk), lambda j, k: (0, k)),           # g1^T
                  pl.BlockSpec((tk, tj), lambda j, k: (k, j))],          # A^T
        out_specs=pl.BlockSpec((32, tj), lambda j, k: (0, j)),
        scratch_shapes=[pltpu.VMEM((32, tj), jnp.float32)],
        compiler_params=pltpu.CompilerParams(
            dimension_semantics=("parallel", "arbitrary"),
            vmem_limit_bytes=vmem_limit),
        cost_estimate=pl.CostEstimate(
            flops=2 * 32 * n_pad * n_pad,
            transcendentals=0,
            bytes_accessed=2 * n_pad * n_pad + 4 * 32 * n_pad),
    )(g1t, adj_t)

    # ---- layer 2 + scatter_mean + fc1/relu/fc2 ------------------------------
    # TODO(synk): the node-tile axis j also carries the pooling reduction
    # (pool_acc scratch), so it stays "arbitrary" here; splitting the fc tail
    # into its own call would let j shard across v7x's two TensorCores.
    out_t = pl.pallas_call(
        _ginet_layer2_tail_kernel,
        out_shape=jax.ShapeDtypeStruct((out_dim, num_graphs), jnp.float32),
        grid=(gj, gk),
        in_specs=[pl.BlockSpec((32, tk), lambda j, k: (0, k)),           # h1^T
                  pl.BlockSpec((tk, tj), lambda j, k: (k, j)),           # A^T
                  pl.BlockSpec((64, 32), lambda j, k: (0, 0)),           # W2^T
                  pl.BlockSpec((tj, num_graphs), lambda j, k: (j, 0)),   # pool^T
                  pl.BlockSpec((128, 64), lambda j, k: (0, 0)),          # fc1 W^T
                  pl.BlockSpec((128, 1), lambda j, k: (0, 0)),           # fc1 b^T
                  pl.BlockSpec((out_dim, 128), lambda j, k: (0, 0)),     # fc2 W^T
                  pl.BlockSpec((out_dim, 1), lambda j, k: (0, 0))],      # fc2 b^T
        out_specs=pl.BlockSpec((out_dim, num_graphs), lambda j, k: (0, 0)),
        scratch_shapes=[pltpu.VMEM((64, tj), jnp.float32),
                        pltpu.VMEM((64, num_graphs), jnp.float32)],
        compiler_params=pltpu.CompilerParams(
            dimension_semantics=("arbitrary", "arbitrary"),
            vmem_limit_bytes=vmem_limit),
        cost_estimate=pl.CostEstimate(
            flops=2 * 64 * n_pad * n_pad,
            transcendentals=0,
            bytes_accessed=2 * n_pad * n_pad + 2 * 32 * n_pad
                           + 4 * n_pad * num_graphs),
    )(h1t, adj_t, w2t, pool_t, fc1wt, fc1bt, fc2wt, fc2bt)

    return out_t.T                                                       # [G, out]


# ----------------------------------------------------------------------------
# Deterministic parameter init (mirrors shapes in GINet.__init__).
# w_edge / w_att are kept so the full-path reference can use them.
# ----------------------------------------------------------------------------
def init_params(key, input_shape, output_shape=1, input_shape_edge=1):
    def uni(k, shape, bound):
        return jax.random.uniform(k, shape, jnp.float32, -bound, bound)

    keys = jax.random.split(key, 16)

    def conv_params(k1, k2, k3, fin, fout, fe):
        b = 1.0 / (fin ** 0.5)       # uniform(size=in_channels, weight)
        return {
            'w_fc': uni(k1, (fin, fout), b),            # Linear(fin, fout, bias=False), transposed
            'w_edge': uni(k2, (fe, fe), b),             # Linear(fe, fe, bias=False), transposed
            'w_att': uni(k3, (2 * fout + fe, 1), b),    # Linear(2*fout+fe, 1, bias=False), transposed
        }

    params = {
        'conv1': conv_params(keys[0], keys[1], keys[2], input_shape, 16, input_shape_edge),
        'conv2': conv_params(keys[3], keys[4], keys[5], 16, 32, input_shape_edge),
        'conv1_ext': conv_params(keys[6], keys[7], keys[8], input_shape, 16, input_shape_edge),
        'conv2_ext': conv_params(keys[9], keys[10], keys[11], 16, 32, input_shape_edge),
    }
    b1 = 1.0 / (64 ** 0.5)
    b2 = 1.0 / (128 ** 0.5)
    params['fc1_w'] = uni(keys[12], (64, 128), b1)            # Linear(64, 128), transposed
    params['fc1_b'] = uni(keys[13], (1, 128), b1)
    params['fc2_w'] = uni(keys[14], (128, output_shape), b2)  # Linear(128, output_shape), transposed
    params['fc2_b'] = uni(keys[15], (1, output_shape), b2)
    return params


# ----------------------------------------------------------------------------
# Pure-JAX reference (exact scatter, FULL attention path) for correctness check.
# ----------------------------------------------------------------------------
def _conv_ref(x, row, col, edge_attr, p):
    xfc = x @ p['w_fc']
    xrow, xcol = xfc[row], xfc[col]
    ed = edge_attr @ p['w_edge']
    a = jnp.concatenate([xrow, xcol, ed], axis=1) @ p['w_att']
    a = jnp.where(a > 0, a, 0.01 * a)           # leaky_relu, slope 0.01
    a = jax.nn.softmax(a, axis=1)               # softmax over size-1 axis == 1.0
    h = a * xcol
    z = jnp.zeros((x.shape[0], xfc.shape[1]), jnp.float32).at[row].add(h)
    return jnp.maximum(z, 0.0)


def ginet_forward_ref(params, x, edge_index, edge_attr, batch, num_graphs):
    if edge_attr.ndim == 1:
        edge_attr = edge_attr[:, None]
    row, col = edge_index[0], edge_index[1]

    def branch(c1, c2):
        h = _conv_ref(x, row, col, edge_attr, c1)
        return _conv_ref(h, row, col, edge_attr, c2)

    xi = branch(params['conv1'], params['conv2'])
    xe = branch(params['conv1_ext'], params['conv2_ext'])
    cnt = jnp.zeros((num_graphs,), jnp.float32).at[batch].add(1.0)[:, None]
    pi = jnp.zeros((num_graphs, xi.shape[1]), jnp.float32).at[batch].add(xi) / cnt
    pe = jnp.zeros((num_graphs, xe.shape[1]), jnp.float32).at[batch].add(xe) / cnt
    h = jnp.concatenate([pi, pe], axis=1) @ params['fc1_w'] + params['fc1_b']
    h = jnp.maximum(h, 0.0)
    return h @ params['fc2_w'] + params['fc2_b']


# ----------------------------------------------------------------------------
if __name__ == "__main__":
    key = jax.random.PRNGKey(0)
    k_x, k_ei, k_ea, k_p = jax.random.split(key, 4)

    N, E, FIN, FE, G, OUT = 12, 24, 8, 1, 2, 1
    x = jax.random.normal(k_x, (N, FIN), jnp.float32)
    edge_index = jax.random.randint(k_ei, (2, E), 0, N)
    edge_attr = jax.random.normal(k_ea, (E,), jnp.float32)     # 1-D edge_attr path
    batch = jnp.array([0] * (N // 2) + [1] * (N // 2), dtype=jnp.int32)

    params = init_params(k_p, FIN, OUT, FE)

    out = ginet_forward(params, x, edge_index, edge_attr, batch, G)
    out = jax.block_until_ready(out)

    ref = ginet_forward_ref(params, x, edge_index, edge_attr, batch, G)
    assert out.shape == (G, OUT)
    # bf16 operands on the MXU for the O(N^2) dots (f32 accumulate) introduce
    # ~1e-3 relative drift on intermediates; tolerance set accordingly.
    assert jnp.allclose(out, ref, atol=1e-2, rtol=1e-2), (out, ref)

    print("KERNEL_OK")
</pallas_src>

<mosaic_0001>
module attributes {stable_mosaic.version = 11 : i64} {
  func.func @_ginet_layer1_kernel(%arg0: i32, %arg1: i32, %arg2: memref<32x128xbf16, #tpu.memory_space<vmem>>, %arg3: memref<128x128xbf16, #tpu.memory_space<vmem>>, %arg4: memref<32x128xbf16, #tpu.memory_space<vmem>>, %arg5: memref<32x128xf32, #tpu.memory_space<vmem>>) attributes {dimension_semantics = [#tpu.dimension_semantics<parallel>, #tpu.dimension_semantics<arbitrary>], iteration_bounds = array<i64: 1, 1>, scalar_prefetch = 0 : i64, scratch_operands = 1 : i64, tpu.core_type = #tpu.core_type<tc>, window_params = [{transform_indices = @transform_0, window_bounds = array<i64: 32, 128>}, {transform_indices = @transform_1, window_bounds = array<i64: 128, 128>}, {transform_indices = @transform_2, window_bounds = array<i64: 32, 128>}]} {
    %c0_i32 = arith.constant 0 : i32
    %0 = arith.cmpi eq, %arg1, %c0_i32 : i32
    %1 = arith.extui %0 : i1 to i32
    %c0_i32_0 = arith.constant 0 : i32
    %2 = arith.cmpi ne, %1, %c0_i32_0 : i32
    scf.if %2 {
      %cst_10 = arith.constant 0.000000e+00 : f32
      %12 = vector.broadcast %cst_10 : f32 to vector<32x128xf32>
      %c0_11 = arith.constant 0 : index
      %c0_12 = arith.constant 0 : index
      %13 = vector.load %arg5[%c0_11, %c0_12] : memref<32x128xf32, #tpu.memory_space<vmem>>, vector<32x128xf32>
      tpu.vector_store %arg5[%c0_11, %c0_12], %12 {strides = array<i32>} : memref<32x128xf32, #tpu.memory_space<vmem>>, vector<32x128xf32>,
    } else {
    }
    %c0 = arith.constant 0 : index
    %c0_1 = arith.constant 0 : index
    %3 = vector.load %arg5[%c0, %c0_1] : memref<32x128xf32, #tpu.memory_space<vmem>>, vector<32x128xf32>
    %c0_2 = arith.constant 0 : index
    %c0_3 = arith.constant 0 : index
    %4 = vector.load %arg2[%c0_2, %c0_3] : memref<32x128xbf16, #tpu.memory_space<vmem>>, vector<32x128xbf16>
    %c0_4 = arith.constant 0 : index
    %c0_5 = arith.constant 0 : index
    %5 = vector.load %arg3[%c0_4, %c0_5] : memref<128x128xbf16, #tpu.memory_space<vmem>>, vector<128x128xbf16>
    %cst = arith.constant dense<0.000000e+00> : vector<32x128xf32>
    %6 = tpu.matmul %4, %5, %cst {dimension_numbers = #tpu.dot_dimension_numbers<[1], [0], [0], [1], [0, 0, 1, 1], [], []>} : vector<32x128xbf16>, vector<128x128xbf16>, vector<32x128xf32> -> vector<32x128xf32>
    %7 = arith.addf %3, %6 : vector<32x128xf32>
    %c0_6 = arith.constant 0 : index
    %c0_7 = arith.constant 0 : index
    %8 = vector.load %arg5[%c0_6, %c0_7] : memref<32x128xf32, #tpu.memory_space<vmem>>, vector<32x128xf32>
    tpu.vector_store %arg5[%c0_6, %c0_7], %7 {strides = array<i32>} : memref<32x128xf32, #tpu.memory_space<vmem>>, vector<32x128xf32>,
    %c0_i32_8 = arith.constant 0 : i32
    %9 = arith.cmpi eq, %arg1, %c0_i32_8 : i32
    %10 = arith.extui %9 : i1 to i32
    %c0_i32_9 = arith.constant 0 : i32
    %11 = arith.cmpi ne, %10, %c0_i32_9 : i32
    scf.if %11 {
      %c0_10 = arith.constant 0 : index
      %c0_11 = arith.constant 0 : index
      %12 = vector.load %arg5[%c0_10, %c0_11] : memref<32x128xf32, #tpu.memory_space<vmem>>, vector<32x128xf32>
      %cst_12 = arith.constant 0.000000e+00 : f32
      %13 = vector.broadcast %cst_12 : f32 to vector<32x128xf32>
      %14 = arith.maximumf %12, %13 : vector<32x128xf32>
      %15 = arith.truncf %14 : vector<32x128xf32> to vector<32x128xbf16>
      %c0_13 = arith.constant 0 : index
      %c0_14 = arith.constant 0 : index
      %16 = vector.load %arg4[%c0_13, %c0_14] : memref<32x128xbf16, #tpu.memory_space<vmem>>, vector<32x128xbf16>
      tpu.vector_store %arg4[%c0_13, %c0_14], %15 {strides = array<i32>} : memref<32x128xbf16, #tpu.memory_space<vmem>>, vector<32x128xbf16>,
    } else {
    }
    return
  }
  func.func @transform_0(%arg0: i32, %arg1: i32) -> (i32, i32) {
    %c0_i32 = arith.constant 0 : i32
    %c0_i32_0 = arith.constant 0 : i32
    return %c0_i32, %arg1 : i32, i32
  }
  func.func @transform_1(%arg0: i32, %arg1: i32) -> (i32, i32) {
    %c0_i32 = arith.constant 0 : i32
    return %arg1, %arg0 : i32, i32
  }
  func.func @transform_2(%arg0: i32, %arg1: i32) -> (i32, i32) {
    %c0_i32 = arith.constant 0 : i32
    %c0_i32_0 = arith.constant 0 : i32
    return %c0_i32, %arg0 : i32, i32
  }
}

</mosaic_0001>

<bundles_post_ra>
// kernel: tpu_custom_call.1
= control target key start
LH: loop header
LB: loop body
LE: loop exit
PB: predicated region body
PF: predicated region fallthrough
CT: control target
= control target key end

     0   :  { %7 = vsyncpa [#allocation4], 0  ;;  %s392_s0 = inlined_call_operand.hbm [shape: bf16[32,128], index: 0, kind: input, shape index: {}]   ;;  %s393_s1 = inlined_call_operand.hbm [shape: bf16[128,128], index: 1, kind: input, shape index: {}]   ;;  %s394_s2 = inlined_call_operand.hbm [shape: bf16[32,128], index: 2, kind: output, shape index: {}]  }
   0x1   :  { %8 = vsyncpa [#allocation7], 0 }
   0x2   :  { %9 = vsyncpa [#allocation5], 0  ;;  %s14_s11 = sshll.u32 %s392_s0, 4  ;;  %s354_s12 = smov [#allocation3]   ;;  %s15_s11 = int_to_ptr.hbm [resolvable:$true] %s14_s11 }
   0x3   :  { %s16_s13 = sshll.u32 %s354_s12, 4  ;;  %s27_s16 = sshll.u32 %s393_s1, 4  ;;  %s17_s13 = int_to_ptr.vmem [resolvable:$true] %s16_s13  ;;  %s28_s16 = int_to_ptr.hbm [resolvable:$true] %s27_s16 }
   0x4   :  { %s355_s17 = smov 64   ;;  %s356_s18 = smov 4  }
   0x5   :  { %22 = dma.hbm_to_vmem [thread:$0]  %s15_s11, 256, %s17_s13, [#allocation4], %s355_s17, %s355_s17, %s356_s18  }
   0x6   :  { %s357_s19 = smov [#allocation6]  }
   0x7   :  { %s29_s20 = sshll.u32 %s357_s19, 4  ;;  %s30_s20 = int_to_ptr.vmem [resolvable:$true] %s29_s20 }
   0x8   :  { %35 = dma.hbm_to_vmem [thread:$0]  %s28_s16, 1024, %s30_s20, [#allocation7], %s355_s17, %s355_s17, %s356_s18  }
   0x9   :  { %348 = dma.done.wait [#allocation4], 256  }
   0xa   :  { %349 = vsyncadd [#allocation4], 4294967040 }
   0xb   :  { %350 = dma.done.wait [#allocation7], 1024  }
   0xc   :  { %351 = vsyncadd [#allocation7], 4294966272  ;;  %v251_v0 = vld [vmem:[#allocation6 + $0x38] sm:$0xff]  ;;  %v250_v1 = vld [vmem:[#allocation6 + $0x30] sm:$0xff]  ;;  %s358_s0 = smov [#allocation8]   ;;  %s188_s23 = sshll.u32 %s394_s2, 4  ;;  %s189_s23 = int_to_ptr.hbm [resolvable:$true] %s188_s23 }
   0xd   :  { %136 = vmatpush.bf16.msra.mxu0 %v251_v0  ;;  %263 = vmatpush.bf16.msra.mxu1 %v251_v0  ;;  %v249_v2 = vld [vmem:[#allocation6 + $0x28] sm:$0xff]  ;;  %v248_v3 = vld [vmem:[#allocation6 + $0x20] sm:$0xff]  ;;  %v247_v4 = vld [vmem:[#allocation6 + $0x18] sm:$0xff]  ;;  %s186_s1 = sshll.u32 %s358_s0, 4  ;;  %s187_s1 = int_to_ptr.vmem [resolvable:$true] %s186_s1 }
   0xe   :  { %v246_v5 = vld [vmem:[#allocation6 + $0x10] sm:$0xff]  ;;  %v245_v6 = vld [vmem:[#allocation6 + $0x8] sm:$0xff]  ;;  %v244_v7 = vld [vmem:[#allocation6] sm:$0xff] }
   0xf   :  { %v242_v8 = vld [vmem:[#allocation3] sm:$0xff]  ;;  %v243_v9 = vld [vmem:[#allocation3 + $0x8] sm:$0xff] }
  0x11   :  { %137 = vmatpush.bf16.msra.mxu0 %v250_v1  ;;  %264 = vmatpush.bf16.msra.mxu1 %v250_v1 }
  0x15   :  { %138 = vmatpush.bf16.msra.mxu0 %v249_v2  ;;  %265 = vmatpush.bf16.msra.mxu1 %v249_v2 }
  0x19   :  { %139 = vmatpush.bf16.msra.mxu0 %v248_v3  ;;  %266 = vmatpush.bf16.msra.mxu1 %v248_v3 }
  0x1d   :  { %140 = vmatpush.bf16.msra.mxu0 %v247_v4  ;;  %267 = vmatpush.bf16.msra.mxu1 %v247_v4 }
  0x21   :  { %141 = vmatpush.bf16.msra.mxu0 %v246_v5  ;;  %268 = vmatpush.bf16.msra.mxu1 %v246_v5 }
  0x25   :  { %142 = vmatpush.bf16.msra.mxu0 %v245_v6  ;;  %269 = vmatpush.bf16.msra.mxu1 %v245_v6 }
  0x29   :  { %143 = vmatpush.bf16.msra.mxu0 %v244_v7  ;;  %270 = vmatpush.bf16.msra.mxu1 %v244_v7 }
  0x2c   :  { %144 = vmatmul.bf16.vlgmr.msra.gmra.mxu0 %v242_v8  ;;  %149 = vmatmul.bf16.vlgmr.msra.gmra.mxu1 %v243_v9 }
  0xa9   :  { %v145_v10 = vpop.f32.mrf.mxu0  ;;  %v150_v11 = vpop.f32.mrf.mxu1 }
  0xaa   :  { %v170_v14 = vmax.f32 %v145_v10, 0.0  ;;  %v172_v15 = vmax.f32 %v150_v11, 0.0 }
  0xb1   :  { %v147_v12 = vpop.f32.mrf.mxu0  ;;  %v152_v13 = vpop.f32.mrf.mxu1 }
  0xb2   :  { %v171_v16 = vmax.f32 %v147_v12, 0.0  ;;  %v173_v17 = vmax.f32 %v152_v13, 0.0 }
  0xb4   :  { %v255_v18 = vpack.c.bf16 %v171_v16, %v170_v14  ;;  %v260_v19 = vpack.c.bf16 %v173_v17, %v172_v15 }
  0xb6   :  { %256 = vst [vmem:[#allocation8] sm:$0xff] %v255_v18  }
  0xb7   :  { %262 = vst [vmem:[#allocation8 + $0x8] sm:$0xff] %v260_v19  }
  0xb8   :  { %194 = dma.vmem_to_hbm [thread:$0]  %s187_s1, 256, %s189_s23, [#allocation5], %s355_s17, %s355_s17, %s356_s18  }
  0xb9   :  { %352 = dma.done.wait [#allocation5], 256  }
  0xba   :  { %353 = vsyncadd [#allocation5], 4294967040 }
  0xbb   :  { %199 = vsyncpa [#allocation4], 1 }
  0xbc   :  { %200 = vsyncpa [#allocation7], 1 }
  0xbd   :  { %201 = vsyncpa [#allocation5], 1 }

</bundles_post_ra>
